<compile_context>
chip_gen: v6e
topology: v6e:2x2x1
jax: 0.10.0
libtpu: 0.0.40
codegen_flags: <defaults>
</compile_context>

<pallas_src>
import functools

import jax
import jax.numpy as jnp
from jax import lax
from jax.experimental import pallas as pl
from jax.experimental.pallas import tpu as pltpu


# ------------------------------ Pallas kernel ------------------------------- #

def _bottleneck_kernel(*refs, H, W, Ho, Wo, stride, has_shortcut):
    """Full Bottleneck block for one batch element, fully resident in VMEM.

    Ref layout (inputs..., output, scratch...):
      x        : (H*W, Cin)        activation rows (NHWC flattened, matmul dtype)
      w1, b1   : (Cin, C1), (1, C1)   conv1 weight (BN1 scale folded) + f32 shift
      w2, b2   : (9, C1, C1), (1, C1) conv2 taps   (BN2 scale folded) + f32 shift
      w3, b3   : (C1, Ce), (1, Ce)    conv3 weight (BN3 scale folded) + f32 shift
      [ws, bs] : (Cin, Ce), (1, Ce)   projection shortcut (only if present)
      o        : (Ho*Wo, Ce)
      pad      : VMEM (H+2, W+2, C1) f32   zero-padded halo buffer for conv2
      [h2f]    : VMEM (H*W, C1)   f32      full-grid conv2 output   (stride>1)
      [h2s]    : VMEM (Ho*Wo, C1) f32      strided-compacted conv2  (stride>1)
      [xs]     : VMEM (Ho*Wo, Cin) f32     strided shortcut rows    (stride>1)
    """
    n_in = 9 if has_shortcut else 7
    in_refs, o_ref, scratch = refs[:n_in], refs[n_in], refs[n_in + 1:]
    if has_shortcut:
        (x_ref, w1_ref, b1_ref, w2_ref, b2_ref, w3_ref, b3_ref,
         ws_ref, bs_ref) = in_refs
    else:
        (x_ref, w1_ref, b1_ref, w2_ref, b2_ref, w3_ref, b3_ref) = in_refs
        ws_ref = bs_ref = None
    pad_ref = scratch[0]
    h2f_ref = h2s_ref = xs_ref = None
    if stride > 1:
        h2f_ref, h2s_ref, xs_ref = scratch[1], scratch[2], scratch[3]

    C1 = w1_ref.shape[1]
    Hp, Wp = H + 2, W + 2
    mdt = w1_ref.dtype                       # MXU input dtype (f32 or bf16)
    f32 = jnp.float32

    x2d = x_ref[...]                                        # (H*W, Cin)

    # ---- conv1 (1x1) + bn1 + relu: one MXU matmul over all H*W rows --------
    h1 = jnp.dot(x2d, w1_ref[...], preferred_element_type=f32)
    h1 = jnp.maximum(h1 + b1_ref[...], 0.0)                 # (H*W, C1) f32

    # ---- zero-padded halo (VMEM): zero ONLY the 1-wide border, then one -----
    # interior store (no full-buffer re-zero, no per-row scatter loop).
    pad_ref[0:1, :, :] = jnp.zeros((1, Wp, C1), f32)
    pad_ref[Hp - 1:Hp, :, :] = jnp.zeros((1, Wp, C1), f32)
    pad_ref[:, 0:1, :] = jnp.zeros((Hp, 1, C1), f32)
    pad_ref[:, Wp - 1:Wp, :] = jnp.zeros((Hp, 1, C1), f32)
    # NOTE: this reshape is a free regroup when W % 8 == 0 (true for 8/56
    # spatial sizes); other sizes incur an XLU relayout, still far cheaper
    # than H separate masked row stores + full re-zero.
    pad_ref[1:H + 1, 1:W + 1, :] = h1.reshape(H, W, C1)

    # ---- conv2 (3x3, pad=1) + bn2 + relu, vectorized over ALL rows ----------
    # 9 static-slice windows of shape (H, W, C1) -> (H*W, C1) MXU matmuls
    # (M = H*W fills the MXU sublanes; no im2col tensor, no per-row loop).
    acc = jnp.zeros((H * W, C1), f32)
    for dy in range(3):                      # 9 static taps, intentionally unrolled
        for dx in range(3):
            win = pad_ref[dy:dy + H, dx:dx + W, :].reshape(H * W, C1)
            acc = acc + jnp.dot(win.astype(mdt), w2_ref[dy * 3 + dx],
                                preferred_element_type=f32)
    h2_full = jnp.maximum(acc + b2_ref[...], 0.0)           # (H*W, C1) f32

    # ---- select the strided output rows (only for downsampling blocks) ------
    if stride == 1:
        h2 = h2_full                         # (Ho*Wo, C1) == (H*W, C1)
        xsc = x2d                            # shortcut rows == input rows
    else:
        h2f_ref[...] = h2_full
        for ho in range(Ho):                 # Ho small strided copies, no matmuls
            src = pl.ds(ho * stride * W, Wo, stride)
            dst = pl.ds(ho * Wo, Wo)
            h2s_ref[dst, :] = h2f_ref[src, :]
            if has_shortcut:
                xs_ref[dst, :] = x_ref[src, :].astype(f32)
        h2 = h2s_ref[...]
        xsc = xs_ref[...] if has_shortcut else None

    # ---- conv3 (1x1) + bn3 + shortcut + add + relu, single HBM store --------
    out = jnp.dot(h2.astype(mdt), w3_ref[...],
                  preferred_element_type=f32) + b3_ref[...]
    if has_shortcut:
        out = out + (jnp.dot(xsc.astype(mdt), ws_ref[...],
                             preferred_element_type=f32) + bs_ref[...])
    else:
        out = out + xsc.astype(f32)          # identity shortcut
    o_ref[...] = jnp.maximum(out, 0.0).astype(o_ref.dtype)


# ------------------------------- JAX wrapper -------------------------------- #

def fold_bn(bn, eps=1e-5):
    gamma, beta, mean, var = bn
    scale = gamma / jnp.sqrt(var + eps)                      # (C,)
    shift = (beta - mean * scale).reshape(1, -1).astype(jnp.float32)
    return scale, shift


def bottleneck_forward(x_nchw, p, stride, *, matmul_dtype=jnp.float32):
    """Fused Bottleneck forward: (N, Cin, H, W) -> (N, 4*planes, Ho, Wo).

    matmul_dtype: f32 matches the f32 reference bit-for-bit in structure; on
    v6e/v7x (and for DMA savings on v5e) use jnp.bfloat16 -- HBM-resident
    activations/weights and all MXU inputs become bf16 while accumulation, BN
    shift / ReLU epilogues and all VMEM scratch stay f32.
    """
    exp = 4
    x = jnp.transpose(x_nchw, (0, 2, 3, 1))                  # NCHW -> NHWC
    N, H, W, Cin = x.shape
    C1 = p["w1"].shape[0]
    Ce = exp * C1
    Ho = (H - 1) // stride + 1
    Wo = (W - 1) // stride + 1
    has_shortcut = bool(p["has_shortcut"])

    # Fold the (inference-mode) BN scale into the conv weights once, host-side.
    s1, b1 = fold_bn(p["bn1"])
    s2, b2 = fold_bn(p["bn2"])
    s3, b3 = fold_bn(p["bn3"])
    w1m = (p["w1"][:, :, 0, 0].T * s1[None, :]).astype(matmul_dtype)      # (Cin, C1)
    w2m = (jnp.transpose(p["w2"], (2, 3, 1, 0)).reshape(9, C1, C1)
           * s2[None, None, :]).astype(matmul_dtype)                       # (9, C1, C1)
    w3m = (p["w3"][:, :, 0, 0].T * s3[None, :]).astype(matmul_dtype)      # (C1, Ce)

    # Single activation input; the shortcut reads it in-kernel (no extra xs DMA).
    x_flat = x.reshape(N, H * W, Cin).astype(matmul_dtype)

    args = [x_flat, w1m, b1, w2m, b2, w3m, b3]
    in_specs = [
        pl.BlockSpec((None, H * W, Cin), lambda i: (i, 0, 0)),
        pl.BlockSpec((Cin, C1), lambda i: (0, 0)),
        pl.BlockSpec((1, C1), lambda i: (0, 0)),
        pl.BlockSpec((9, C1, C1), lambda i: (0, 0, 0)),
        pl.BlockSpec((1, C1), lambda i: (0, 0)),
        pl.BlockSpec((C1, Ce), lambda i: (0, 0)),
        pl.BlockSpec((1, Ce), lambda i: (0, 0)),
    ]
    if has_shortcut:
        ss, bs = fold_bn(p["bns"])
        wsm = (p["ws"][:, :, 0, 0].T * ss[None, :]).astype(matmul_dtype)  # (Cin, Ce)
        args += [wsm, bs]
        in_specs += [pl.BlockSpec((Cin, Ce), lambda i: (0, 0)),
                     pl.BlockSpec((1, Ce), lambda i: (0, 0))]

    # All scratch stays f32 (robust masked-store/strided-load path); bf16 only
    # affects HBM-resident tensors and MXU inputs.
    scratch_shapes = [pltpu.VMEM((H + 2, W + 2, C1), jnp.float32)]   # halo buffer
    if stride > 1:
        scratch_shapes += [pltpu.VMEM((H * W, C1), jnp.float32),     # full conv2 grid
                           pltpu.VMEM((Ho * Wo, C1), jnp.float32),   # strided conv2 rows
                           pltpu.VMEM((Ho * Wo, Cin), jnp.float32)]  # strided shortcut rows

    flops = 2 * N * (H * W * Cin * C1 + 9 * H * W * C1 * C1 + Ho * Wo * C1 * Ce
                     + (Ho * Wo * Cin * Ce if has_shortcut else 0))
    bytes_accessed = int(sum(a.size * a.dtype.itemsize for a in args)
                         + N * Ho * Wo * Ce * jnp.dtype(x_nchw.dtype).itemsize)

    kernel = functools.partial(_bottleneck_kernel, H=H, W=W, Ho=Ho, Wo=Wo,
                               stride=stride, has_shortcut=has_shortcut)

    # NOTE: at production shapes (e.g. 56x56x256 f32) check the per-step VMEM
    # footprint against v5e's 16 MiB / v7x's 32 MiB scoped defaults and raise
    # pltpu.CompilerParams(vmem_limit_bytes=...) or add the row-tile grid axis
    # (see module TODO); at these demo shapes it is a few KiB.
    out = pl.pallas_call(
        kernel,
        out_shape=jax.ShapeDtypeStruct((N, Ho * Wo, Ce), x_nchw.dtype),
        grid=(N,),
        in_specs=in_specs,
        out_specs=pl.BlockSpec((None, Ho * Wo, Ce), lambda i: (i, 0, 0)),
        scratch_shapes=scratch_shapes,
        compiler_params=pltpu.CompilerParams(
            dimension_semantics=("parallel",)),      # batch across v7x's 2 TCs
        cost_estimate=pl.CostEstimate(flops=flops, transcendentals=0,
                                      bytes_accessed=bytes_accessed),
    )(*args)

    out = out.reshape(N, Ho, Wo, Ce)
    return jnp.transpose(out, (0, 3, 1, 2))                  # NHWC -> NCHW


# --------------------------- synthetic parameters --------------------------- #

def init_params(key, in_planes, planes, stride, dtype=jnp.float32):
    """Deterministic synthetic params matching Bottleneck.__init__ shapes."""
    exp = 4
    ks = jax.random.split(key, 8)

    def conv_w(k, shape):
        return (0.1 * jax.random.normal(k, shape, dtype)).astype(dtype)

    def bn_params(k, c):
        k1, k2, k3, k4 = jax.random.split(k, 4)
        gamma = 1.0 + 0.1 * jax.random.normal(k1, (c,), dtype)
        beta = 0.1 * jax.random.normal(k2, (c,), dtype)
        mean = 0.1 * jax.random.normal(k3, (c,), dtype)
        var = 1.0 + 0.1 * jnp.abs(jax.random.normal(k4, (c,), dtype))
        return gamma, beta, mean, var

    p = {
        "w1": conv_w(ks[0], (planes, in_planes, 1, 1)),
        "bn1": bn_params(ks[1], planes),
        "w2": conv_w(ks[2], (planes, planes, 3, 3)),
        "bn2": bn_params(ks[3], planes),
        "w3": conv_w(ks[4], (exp * planes, planes, 1, 1)),
        "bn3": bn_params(ks[5], exp * planes),
        "has_shortcut": (stride != 1) or (in_planes != exp * planes),
    }
    if p["has_shortcut"]:
        p["ws"] = conv_w(ks[6], (exp * planes, in_planes, 1, 1))
        p["bns"] = bn_params(ks[7], exp * planes)
    return p


# ---------------------------- pure-JAX reference ----------------------------- #

def reference_forward(x_nchw, p, stride, eps=1e-5):
    def conv(x, w, s, pad):
        return lax.conv_general_dilated(
            x, w, window_strides=(s, s), padding=pad,
            dimension_numbers=("NCHW", "OIHW", "NCHW"))

    def bn(x, params):
        gamma, beta, mean, var = params
        scale = gamma / jnp.sqrt(var + eps)
        shift = beta - mean * scale
        return x * scale[None, :, None, None] + shift[None, :, None, None]

    out = jax.nn.relu(bn(conv(x_nchw, p["w1"], 1, [(0, 0), (0, 0)]), p["bn1"]))
    out = jax.nn.relu(bn(conv(out, p["w2"], stride, [(1, 1), (1, 1)]), p["bn2"]))
    out = bn(conv(out, p["w3"], 1, [(0, 0), (0, 0)]), p["bn3"])
    if p["has_shortcut"]:
        sc = bn(conv(x_nchw, p["ws"], stride, [(0, 0), (0, 0)]), p["bns"])
    else:
        sc = x_nchw
    return jax.nn.relu(out + sc)


if __name__ == "__main__":
    key = jax.random.PRNGKey(0)
    kx1, kp1, kx2, kp2, kx3, kp3 = jax.random.split(key, 6)

    # Config 1: projection shortcut, stride 2 (strided conv2 + strided shortcut).
    N, in_planes, planes, H, W, stride = 2, 16, 8, 8, 8, 2
    x1 = jax.random.normal(kx1, (N, in_planes, H, W), jnp.float32)
    p1 = init_params(kp1, in_planes, planes, stride)
    out1 = jax.block_until_ready(bottleneck_forward(x1, p1, stride))
    ref1 = reference_forward(x1, p1, stride)
    assert out1.shape == ref1.shape, (out1.shape, ref1.shape)
    err1 = float(jnp.max(jnp.abs(out1 - ref1)))
    assert jnp.allclose(out1, ref1, atol=1e-3, rtol=1e-3), err1

    # Config 2: identity shortcut (stride 1, in_planes == 4*planes).
    N2, in_planes2, planes2, H2, W2, stride2 = 2, 32, 8, 8, 8, 1
    x2 = jax.random.normal(kx2, (N2, in_planes2, H2, W2), jnp.float32)
    p2 = init_params(kp2, in_planes2, planes2, stride2)
    out2 = jax.block_until_ready(bottleneck_forward(x2, p2, stride2))
    ref2 = reference_forward(x2, p2, stride2)
    assert out2.shape == ref2.shape, (out2.shape, ref2.shape)
    err2 = float(jnp.max(jnp.abs(out2 - ref2)))
    assert jnp.allclose(out2, ref2, atol=1e-3, rtol=1e-3), err2

    # Config 3: projection shortcut with stride 1 (in_planes != 4*planes).
    N3, in_planes3, planes3, H3, W3, stride3 = 2, 16, 8, 8, 8, 1
    x3 = jax.random.normal(kx3, (N3, in_planes3, H3, W3), jnp.float32)
    p3 = init_params(kp3, in_planes3, planes3, stride3)
    out3 = jax.block_until_ready(bottleneck_forward(x3, p3, stride3))
    ref3 = reference_forward(x3, p3, stride3)
    assert out3.shape == ref3.shape, (out3.shape, ref3.shape)
    err3 = float(jnp.max(jnp.abs(out3 - ref3)))
    assert jnp.allclose(out3, ref3, atol=1e-3, rtol=1e-3), err3

    # Config 4: bf16 MXU-input path (v6e/v7x knob); f32 accumulation/epilogue.
    # Expected bf16 input quantization error vs. the f32 reference, not a bug.
    out3b = jax.block_until_ready(
        bottleneck_forward(x3, p3, stride3, matmul_dtype=jnp.bfloat16))
    errb = float(jnp.max(jnp.abs(out3b - ref3)))
    assert errb < 0.2, errb

    print("KERNEL_OK")
</pallas_src>

<mosaic_0001>
module attributes {stable_mosaic.version = 11 : i64} {
  func.func @_bottleneck_kernel(%arg0: i32, %arg1: memref<1x64x16xf32, #tpu.memory_space<vmem>>, %arg2: memref<16x8xf32, #tpu.memory_space<vmem>>, %arg3: memref<1x8xf32, #tpu.memory_space<vmem>>, %arg4: memref<9x8x8xf32, #tpu.memory_space<vmem>>, %arg5: memref<1x8xf32, #tpu.memory_space<vmem>>, %arg6: memref<8x32xf32, #tpu.memory_space<vmem>>, %arg7: memref<1x32xf32, #tpu.memory_space<vmem>>, %arg8: memref<16x32xf32, #tpu.memory_space<vmem>>, %arg9: memref<1x32xf32, #tpu.memory_space<vmem>>, %arg10: memref<1x16x32xf32, #tpu.memory_space<vmem>>, %arg11: memref<10x10x8xf32, #tpu.memory_space<vmem>>, %arg12: memref<64x8xf32, #tpu.memory_space<vmem>>, %arg13: memref<16x8xf32, #tpu.memory_space<vmem>>, %arg14: memref<16x16xf32, #tpu.memory_space<vmem>>) attributes {dimension_semantics = [#tpu.dimension_semantics<parallel>], iteration_bounds = array<i64: 2>, scalar_prefetch = 0 : i64, scratch_operands = 4 : i64, tpu.core_type = #tpu.core_type<tc>, window_params = [{transform_indices = @transform_0, window_bounds = array<i64: 1, 64, 16>}, {pipeline_mode = #tpu.pipeline_mode<synchronous>, transform_indices = @transform_1, window_bounds = array<i64: 16, 8>}, {pipeline_mode = #tpu.pipeline_mode<synchronous>, transform_indices = @transform_2, window_bounds = array<i64: 1, 8>}, {pipeline_mode = #tpu.pipeline_mode<synchronous>, transform_indices = @transform_3, window_bounds = array<i64: 9, 8, 8>}, {pipeline_mode = #tpu.pipeline_mode<synchronous>, transform_indices = @transform_4, window_bounds = array<i64: 1, 8>}, {pipeline_mode = #tpu.pipeline_mode<synchronous>, transform_indices = @transform_5, window_bounds = array<i64: 8, 32>}, {pipeline_mode = #tpu.pipeline_mode<synchronous>, transform_indices = @transform_6, window_bounds = array<i64: 1, 32>}, {pipeline_mode = #tpu.pipeline_mode<synchronous>, transform_indices = @transform_7, window_bounds = array<i64: 16, 32>}, {pipeline_mode = #tpu.pipeline_mode<synchronous>, transform_indices = @transform_8, window_bounds = array<i64: 1, 32>}, {transform_indices = @transform_9, window_bounds = array<i64: 1, 16, 32>}]} {
    %c0 = arith.constant 0 : index
    %c0_0 = arith.constant 0 : index
    %c0_1 = arith.constant 0 : index
    %0 = vector.load %arg1[%c0, %c0_0, %c0_1] : memref<1x64x16xf32, #tpu.memory_space<vmem>>, vector<1x64x16xf32>
    %1 = vector.shape_cast %0 : vector<1x64x16xf32> to vector<64x16xf32>
    %c0_2 = arith.constant 0 : index
    %c0_3 = arith.constant 0 : index
    %2 = vector.load %arg2[%c0_2, %c0_3] : memref<16x8xf32, #tpu.memory_space<vmem>>, vector<16x8xf32>
    %cst = arith.constant dense<0.000000e+00> : vector<64x8xf32>
    %3 = tpu.matmul %1, %2, %cst {dimension_numbers = #tpu.dot_dimension_numbers<[1], [0], [0], [1], [0, 0, 1, 1], [], []>} : vector<64x16xf32>, vector<16x8xf32>, vector<64x8xf32> -> vector<64x8xf32>
    %c0_4 = arith.constant 0 : index
    %c0_5 = arith.constant 0 : index
    %4 = vector.load %arg3[%c0_4, %c0_5] : memref<1x8xf32, #tpu.memory_space<vmem>>, vector<1x8xf32>
    %5 = vector.broadcast %4 : vector<1x8xf32> to vector<64x8xf32>
    %6 = arith.addf %3, %5 : vector<64x8xf32>
    %cst_6 = arith.constant 0.000000e+00 : f32
    %7 = vector.broadcast %cst_6 : f32 to vector<64x8xf32>
    %8 = arith.maximumf %6, %7 : vector<64x8xf32>
    %cst_7 = arith.constant 0.000000e+00 : f32
    %9 = vector.broadcast %cst_7 : f32 to vector<1x10x8xf32>
    %c0_8 = arith.constant 0 : index
    %c0_9 = arith.constant 0 : index
    %c0_10 = arith.constant 0 : index
    %10 = vector.load %arg11[%c0_8, %c0_9, %c0_10] : memref<10x10x8xf32, #tpu.memory_space<vmem>>, vector<1x10x8xf32>
    tpu.vector_store %arg11[%c0_8, %c0_9, %c0_10], %9 {strides = array<i32>} : memref<10x10x8xf32, #tpu.memory_space<vmem>>, vector<1x10x8xf32>,
    %cst_11 = arith.constant 0.000000e+00 : f32
    %11 = vector.broadcast %cst_11 : f32 to vector<1x10x8xf32>
    %c9 = arith.constant 9 : index
    %c0_12 = arith.constant 0 : index
    %c0_13 = arith.constant 0 : index
    %12 = vector.load %arg11[%c9, %c0_12, %c0_13] : memref<10x10x8xf32, #tpu.memory_space<vmem>>, vector<1x10x8xf32>
    tpu.vector_store %arg11[%c9, %c0_12, %c0_13], %11 {strides = array<i32>} : memref<10x10x8xf32, #tpu.memory_space<vmem>>, vector<1x10x8xf32>,
    %cst_14 = arith.constant 0.000000e+00 : f32
    %13 = vector.broadcast %cst_14 : f32 to vector<10x1x8xf32>
    %c0_15 = arith.constant 0 : index
    %c0_16 = arith.constant 0 : index
    %c0_17 = arith.constant 0 : index
    %14 = vector.load %arg11[%c0_15, %c0_16, %c0_17] : memref<10x10x8xf32, #tpu.memory_space<vmem>>, vector<10x1x8xf32>
    tpu.vector_store %arg11[%c0_15, %c0_16, %c0_17], %13 {strides = array<i32>} : memref<10x10x8xf32, #tpu.memory_space<vmem>>, vector<10x1x8xf32>,
    %cst_18 = arith.constant 0.000000e+00 : f32
    %15 = vector.broadcast %cst_18 : f32 to vector<10x1x8xf32>
    %c0_19 = arith.constant 0 : index
    %c9_20 = arith.constant 9 : index
    %c0_21 = arith.constant 0 : index
    %16 = vector.load %arg11[%c0_19, %c9_20, %c0_21] : memref<10x10x8xf32, #tpu.memory_space<vmem>>, vector<10x1x8xf32>
    tpu.vector_store %arg11[%c0_19, %c9_20, %c0_21], %15 {strides = array<i32>} : memref<10x10x8xf32, #tpu.memory_space<vmem>>, vector<10x1x8xf32>,
    %17 = vector.shape_cast %8 : vector<64x8xf32> to vector<8x8x8xf32>
    %c1 = arith.constant 1 : index
    %c1_22 = arith.constant 1 : index
    %c0_23 = arith.constant 0 : index
    %18 = vector.load %arg11[%c1, %c1_22, %c0_23] : memref<10x10x8xf32, #tpu.memory_space<vmem>>, vector<8x8x8xf32>
    tpu.vector_store %arg11[%c1, %c1_22, %c0_23], %17 {strides = array<i32>} : memref<10x10x8xf32, #tpu.memory_space<vmem>>, vector<8x8x8xf32>,
    %cst_24 = arith.constant 0.000000e+00 : f32
    %19 = vector.broadcast %cst_24 : f32 to vector<64x8xf32>
    %c0_25 = arith.constant 0 : index
    %c0_26 = arith.constant 0 : index
    %c0_27 = arith.constant 0 : index
    %20 = vector.load %arg11[%c0_25, %c0_26, %c0_27] : memref<10x10x8xf32, #tpu.memory_space<vmem>>, vector<8x8x8xf32>
    %21 = vector.shape_cast %20 : vector<8x8x8xf32> to vector<64x8xf32>
    %c0_28 = arith.constant 0 : index
    %c0_29 = arith.constant 0 : index
    %c0_30 = arith.constant 0 : index
    %22 = vector.load %arg4[%c0_28, %c0_29, %c0_30] : memref<9x8x8xf32, #tpu.memory_space<vmem>>, vector<1x8x8xf32>
    %23 = vector.shape_cast %22 : vector<1x8x8xf32> to vector<8x8xf32>
    %cst_31 = arith.constant dense<0.000000e+00> : vector<64x8xf32>
    %24 = tpu.matmul %21, %23, %cst_31 {dimension_numbers = #tpu.dot_dimension_numbers<[1], [0], [0], [1], [0, 0, 1, 1], [], []>} : vector<64x8xf32>, vector<8x8xf32>, vector<64x8xf32> -> vector<64x8xf32>
    %25 = arith.addf %19, %24 : vector<64x8xf32>
    %c0_32 = arith.constant 0 : index
    %c1_33 = arith.constant 1 : index
    %c0_34 = arith.constant 0 : index
    %26 = vector.load %arg11[%c0_32, %c1_33, %c0_34] : memref<10x10x8xf32, #tpu.memory_space<vmem>>, vector<8x8x8xf32>
    %27 = vector.shape_cast %26 : vector<8x8x8xf32> to vector<64x8xf32>
    %c1_35 = arith.constant 1 : index
    %c0_36 = arith.constant 0 : index
    %c0_37 = arith.constant 0 : index
    %28 = vector.load %arg4[%c1_35, %c0_36, %c0_37] : memref<9x8x8xf32, #tpu.memory_space<vmem>>, vector<1x8x8xf32>
    %29 = vector.shape_cast %28 : vector<1x8x8xf32> to vector<8x8xf32>
    %cst_38 = arith.constant dense<0.000000e+00> : vector<64x8xf32>
    %30 = tpu.matmul %27, %29, %cst_38 {dimension_numbers = #tpu.dot_dimension_numbers<[1], [0], [0], [1], [0, 0, 1, 1], [], []>} : vector<64x8xf32>, vector<8x8xf32>, vector<64x8xf32> -> vector<64x8xf32>
    %31 = arith.addf %25, %30 : vector<64x8xf32>
    %c0_39 = arith.constant 0 : index
    %c2 = arith.constant 2 : index
    %c0_40 = arith.constant 0 : index
    %32 = vector.load %arg11[%c0_39, %c2, %c0_40] : memref<10x10x8xf32, #tpu.memory_space<vmem>>, vector<8x8x8xf32>
    %33 = vector.shape_cast %32 : vector<8x8x8xf32> to vector<64x8xf32>
    %c2_41 = arith.constant 2 : index
    %c0_42 = arith.constant 0 : index
    %c0_43 = arith.constant 0 : index
    %34 = vector.load %arg4[%c2_41, %c0_42, %c0_43] : memref<9x8x8xf32, #tpu.memory_space<vmem>>, vector<1x8x8xf32>
    %35 = vector.shape_cast %34 : vector<1x8x8xf32> to vector<8x8xf32>
    %cst_44 = arith.constant dense<0.000000e+00> : vector<64x8xf32>
    %36 = tpu.matmul %33, %35, %cst_44 {dimension_numbers = #tpu.dot_dimension_numbers<[1], [0], [0], [1], [0, 0, 1, 1], [], []>} : vector<64x8xf32>, vector<8x8xf32>, vector<64x8xf32> -> vector<64x8xf32>
    %37 = arith.addf %31, %36 : vector<64x8xf32>
    %c1_45 = arith.constant 1 : index
    %c0_46 = arith.constant 0 : index
    %c0_47 = arith.constant 0 : index
    %38 = vector.load %arg11[%c1_45, %c0_46, %c0_47] : memref<10x10x8xf32, #tpu.memory_space<vmem>>, vector<8x8x8xf32>
    %39 = vector.shape_cast %38 : vector<8x8x8xf32> to vector<64x8xf32>
    %c3 = arith.constant 3 : index
    %c0_48 = arith.constant 0 : index
    %c0_49 = arith.constant 0 : index
    %40 = vector.load %arg4[%c3, %c0_48, %c0_49] : memref<9x8x8xf32, #tpu.memory_space<vmem>>, vector<1x8x8xf32>
    %41 = vector.shape_cast %40 : vector<1x8x8xf32> to vector<8x8xf32>
    %cst_50 = arith.constant dense<0.000000e+00> : vector<64x8xf32>
    %42 = tpu.matmul %39, %41, %cst_50 {dimension_numbers = #tpu.dot_dimension_numbers<[1], [0], [0], [1], [0, 0, 1, 1], [], []>} : vector<64x8xf32>, vector<8x8xf32>, vector<64x8xf32> -> vector<64x8xf32>
    %43 = arith.addf %37, %42 : vector<64x8xf32>
    %c1_51 = arith.constant 1 : index
    %c1_52 = arith.constant 1 : index
    %c0_53 = arith.constant 0 : index
    %44 = vector.load %arg11[%c1_51, %c1_52, %c0_53] : memref<10x10x8xf32, #tpu.memory_space<vmem>>, vector<8x8x8xf32>
    %45 = vector.shape_cast %44 : vector<8x8x8xf32> to vector<64x8xf32>
    %c4 = arith.constant 4 : index
    %c0_54 = arith.constant 0 : index
    %c0_55 = arith.constant 0 : index
    %46 = vector.load %arg4[%c4, %c0_54, %c0_55] : memref<9x8x8xf32, #tpu.memory_space<vmem>>, vector<1x8x8xf32>
    %47 = vector.shape_cast %46 : vector<1x8x8xf32> to vector<8x8xf32>
    %cst_56 = arith.constant dense<0.000000e+00> : vector<64x8xf32>
    %48 = tpu.matmul %45, %47, %cst_56 {dimension_numbers = #tpu.dot_dimension_numbers<[1], [0], [0], [1], [0, 0, 1, 1], [], []>} : vector<64x8xf32>, vector<8x8xf32>, vector<64x8xf32> -> vector<64x8xf32>
    %49 = arith.addf %43, %48 : vector<64x8xf32>
    %c1_57 = arith.constant 1 : index
    %c2_58 = arith.constant 2 : index
    %c0_59 = arith.constant 0 : index
    %50 = vector.load %arg11[%c1_57, %c2_58, %c0_59] : memref<10x10x8xf32, #tpu.memory_space<vmem>>, vector<8x8x8xf32>
    %51 = vector.shape_cast %50 : vector<8x8x8xf32> to vector<64x8xf32>
    %c5 = arith.constant 5 : index
    %c0_60 = arith.constant 0 : index
    %c0_61 = arith.constant 0 : index
    %52 = vector.load %arg4[%c5, %c0_60, %c0_61] : memref<9x8x8xf32, #tpu.memory_space<vmem>>, vector<1x8x8xf32>
    %53 = vector.shape_cast %52 : vector<1x8x8xf32> to vector<8x8xf32>
    %cst_62 = arith.constant dense<0.000000e+00> : vector<64x8xf32>
    %54 = tpu.matmul %51, %53, %cst_62 {dimension_numbers = #tpu.dot_dimension_numbers<[1], [0], [0], [1], [0, 0, 1, 1], [], []>} : vector<64x8xf32>, vector<8x8xf32>, vector<64x8xf32> -> vector<64x8xf32>
    %55 = arith.addf %49, %54 : vector<64x8xf32>
    %c2_63 = arith.constant 2 : index
    %c0_64 = arith.constant 0 : index
    %c0_65 = arith.constant 0 : index
    %56 = vector.load %arg11[%c2_63, %c0_64, %c0_65] : memref<10x10x8xf32, #tpu.memory_space<vmem>>, vector<8x8x8xf32>
    %57 = vector.shape_cast %56 : vector<8x8x8xf32> to vector<64x8xf32>
    %c6 = arith.constant 6 : index
    %c0_66 = arith.constant 0 : index
    %c0_67 = arith.constant 0 : index
    %58 = vector.load %arg4[%c6, %c0_66, %c0_67] : memref<9x8x8xf32, #tpu.memory_space<vmem>>, vector<1x8x8xf32>
    %59 = vector.shape_cast %58 : vector<1x8x8xf32> to vector<8x8xf32>
    %cst_68 = arith.constant dense<0.000000e+00> : vector<64x8xf32>
    %60 = tpu.matmul %57, %59, %cst_68 {dimension_numbers = #tpu.dot_dimension_numbers<[1], [0], [0], [1], [0, 0, 1, 1], [], []>} : vector<64x8xf32>, vector<8x8xf32>, vector<64x8xf32> -> vector<64x8xf32>
    %61 = arith.addf %55, %60 : vector<64x8xf32>
    %c2_69 = arith.constant 2 : index
    %c1_70 = arith.constant 1 : index
    %c0_71 = arith.constant 0 : index
    %62 = vector.load %arg11[%c2_69, %c1_70, %c0_71] : memref<10x10x8xf32, #tpu.memory_space<vmem>>, vector<8x8x8xf32>
    %63 = vector.shape_cast %62 : vector<8x8x8xf32> to vector<64x8xf32>
    %c7 = arith.constant 7 : index
    %c0_72 = arith.constant 0 : index
    %c0_73 = arith.constant 0 : index
    %64 = vector.load %arg4[%c7, %c0_72, %c0_73] : memref<9x8x8xf32, #tpu.memory_space<vmem>>, vector<1x8x8xf32>
    %65 = vector.shape_cast %64 : vector<1x8x8xf32> to vector<8x8xf32>
    %cst_74 = arith.constant dense<0.000000e+00> : vector<64x8xf32>
    %66 = tpu.matmul %63, %65, %cst_74 {dimension_numbers = #tpu.dot_dimension_numbers<[1], [0], [0], [1], [0, 0, 1, 1], [], []>} : vector<64x8xf32>, vector<8x8xf32>, vector<64x8xf32> -> vector<64x8xf32>
    %67 = arith.addf %61, %66 : vector<64x8xf32>
    %c2_75 = arith.constant 2 : index
    %c2_76 = arith.constant 2 : index
    %c0_77 = arith.constant 0 : index
    %68 = vector.load %arg11[%c2_75, %c2_76, %c0_77] : memref<10x10x8xf32, #tpu.memory_space<vmem>>, vector<8x8x8xf32>
    %69 = vector.shape_cast %68 : vector<8x8x8xf32> to vector<64x8xf32>
    %c8 = arith.constant 8 : index
    %c0_78 = arith.constant 0 : index
    %c0_79 = arith.constant 0 : index
    %70 = vector.load %arg4[%c8, %c0_78, %c0_79] : memref<9x8x8xf32, #tpu.memory_space<vmem>>, vector<1x8x8xf32>
    %71 = vector.shape_cast %70 : vector<1x8x8xf32> to vector<8x8xf32>
    %cst_80 = arith.constant dense<0.000000e+00> : vector<64x8xf32>
    %72 = tpu.matmul %69, %71, %cst_80 {dimension_numbers = #tpu.dot_dimension_numbers<[1], [0], [0], [1], [0, 0, 1, 1], [], []>} : vector<64x8xf32>, vector<8x8xf32>, vector<64x8xf32> -> vector<64x8xf32>
    %73 = arith.addf %67, %72 : vector<64x8xf32>
    %c0_81 = arith.constant 0 : index
    %c0_82 = arith.constant 0 : index
    %74 = vector.load %arg5[%c0_81, %c0_82] : memref<1x8xf32, #tpu.memory_space<vmem>>, vector<1x8xf32>
    %75 = vector.broadcast %74 : vector<1x8xf32> to vector<64x8xf32>
    %76 = arith.addf %73, %75 : vector<64x8xf32>
    %cst_83 = arith.constant 0.000000e+00 : f32
    %77 = vector.broadcast %cst_83 : f32 to vector<64x8xf32>
    %78 = arith.maximumf %76, %77 : vector<64x8xf32>
    %c0_84 = arith.constant 0 : index
    %c0_85 = arith.constant 0 : index
    %79 = vector.load %arg12[%c0_84, %c0_85] : memref<64x8xf32, #tpu.memory_space<vmem>>, vector<64x8xf32>
    tpu.vector_store %arg12[%c0_84, %c0_85], %78 {strides = array<i32>} : memref<64x8xf32, #tpu.memory_space<vmem>>, vector<64x8xf32>,
    %c0_86 = arith.constant 0 : index
    %c0_87 = arith.constant 0 : index
    %80 = tpu.strided_load %arg12[%c0_86, %c0_87] {strides = array<i32: 2, 1>} : memref<64x8xf32, #tpu.memory_space<vmem>>, vector<4x8xf32>
    %c0_88 = arith.constant 0 : index
    %c0_89 = arith.constant 0 : index
    %81 = vector.load %arg13[%c0_88, %c0_89] : memref<16x8xf32, #tpu.memory_space<vmem>>, vector<4x8xf32>
    tpu.vector_store %arg13[%c0_88, %c0_89], %80 {strides = array<i32>} : memref<16x8xf32, #tpu.memory_space<vmem>>, vector<4x8xf32>,
    %c0_90 = arith.constant 0 : index
    %c0_91 = arith.constant 0 : index
    %c0_92 = arith.constant 0 : index
    %82 = tpu.strided_load %arg1[%c0_90, %c0_91, %c0_92] {strides = array<i32: 1, 2, 1>} : memref<1x64x16xf32, #tpu.memory_space<vmem>>, vector<1x4x16xf32>
    %83 = vector.shape_cast %82 : vector<1x4x16xf32> to vector<4x16xf32>
    %c0_93 = arith.constant 0 : index
    %c0_94 = arith.constant 0 : index
    %84 = vector.load %arg14[%c0_93, %c0_94] : memref<16x16xf32, #tpu.memory_space<vmem>>, vector<4x16xf32>
    tpu.vector_store %arg14[%c0_93, %c0_94], %83 {strides = array<i32>} : memref<16x16xf32, #tpu.memory_space<vmem>>, vector<4x16xf32>,
    %c16 = arith.constant 16 : index
    %c0_95 = arith.constant 0 : index
    %85 = tpu.strided_load %arg12[%c16, %c0_95] {strides = array<i32: 2, 1>} : memref<64x8xf32, #tpu.memory_space<vmem>>, vector<4x8xf32>
    %c4_96 = arith.constant 4 : index
    %c0_97 = arith.constant 0 : index
    %86 = vector.load %arg13[%c4_96, %c0_97] : memref<16x8xf32, #tpu.memory_space<vmem>>, vector<4x8xf32>
    tpu.vector_store %arg13[%c4_96, %c0_97], %85 {strides = array<i32>} : memref<16x8xf32, #tpu.memory_space<vmem>>, vector<4x8xf32>,
    %c0_98 = arith.constant 0 : index
    %c16_99 = arith.constant 16 : index
    %c0_100 = arith.constant 0 : index
    %87 = tpu.strided_load %arg1[%c0_98, %c16_99, %c0_100] {strides = array<i32: 1, 2, 1>} : memref<1x64x16xf32, #tpu.memory_space<vmem>>, vector<1x4x16xf32>
    %88 = vector.shape_cast %87 : vector<1x4x16xf32> to vector<4x16xf32>
    %c4_101 = arith.constant 4 : index
    %c0_102 = arith.constant 0 : index
    %89 = vector.load %arg14[%c4_101, %c0_102] : memref<16x16xf32, #tpu.memory_space<vmem>>, vector<4x16xf32>
    tpu.vector_store %arg14[%c4_101, %c0_102], %88 {strides = array<i32>} : memref<16x16xf32, #tpu.memory_space<vmem>>, vector<4x16xf32>,
    %c32 = arith.constant 32 : index
    %c0_103 = arith.constant 0 : index
    %90 = tpu.strided_load %arg12[%c32, %c0_103] {strides = array<i32: 2, 1>} : memref<64x8xf32, #tpu.memory_space<vmem>>, vector<4x8xf32>
    %c8_104 = arith.constant 8 : index
    %c0_105 = arith.constant 0 : index
    %91 = vector.load %arg13[%c8_104, %c0_105] : memref<16x8xf32, #tpu.memory_space<vmem>>, vector<4x8xf32>
    tpu.vector_store %arg13[%c8_104, %c0_105], %90 {strides = array<i32>} : memref<16x8xf32, #tpu.memory_space<vmem>>, vector<4x8xf32>,
    %c0_106 = arith.constant 0 : index
    %c32_107 = arith.constant 32 : index
    %c0_108 = arith.constant 0 : index
    %92 = tpu.strided_load %arg1[%c0_106, %c32_107, %c0_108] {strides = array<i32: 1, 2, 1>} : memref<1x64x16xf32, #tpu.memory_space<vmem>>, vector<1x4x16xf32>
    %93 = vector.shape_cast %92 : vector<1x4x16xf32> to vector<4x16xf32>
    %c8_109 = arith.constant 8 : index
    %c0_110 = arith.constant 0 : index
    %94 = vector.load %arg14[%c8_109, %c0_110] : memref<16x16xf32, #tpu.memory_space<vmem>>, vector<4x16xf32>
    tpu.vector_store %arg14[%c8_109, %c0_110], %93 {strides = array<i32>} : memref<16x16xf32, #tpu.memory_space<vmem>>, vector<4x16xf32>,
    %c48 = arith.constant 48 : index
    %c0_111 = arith.constant 0 : index
    %95 = tpu.strided_load %arg12[%c48, %c0_111] {strides = array<i32: 2, 1>} : memref<64x8xf32, #tpu.memory_space<vmem>>, vector<4x8xf32>
    %c12 = arith.constant 12 : index
    %c0_112 = arith.constant 0 : index
    %96 = vector.load %arg13[%c12, %c0_112] : memref<16x8xf32, #tpu.memory_space<vmem>>, vector<4x8xf32>
    tpu.vector_store %arg13[%c12, %c0_112], %95 {strides = array<i32>} : memref<16x8xf32, #tpu.memory_space<vmem>>, vector<4x8xf32>,
    %c0_113 = arith.constant 0 : index
    %c48_114 = arith.constant 48 : index
    %c0_115 = arith.constant 0 : index
    %97 = tpu.strided_load %arg1[%c0_113, %c48_114, %c0_115] {strides = array<i32: 1, 2, 1>} : memref<1x64x16xf32, #tpu.memory_space<vmem>>, vector<1x4x16xf32>
    %98 = vector.shape_cast %97 : vector<1x4x16xf32> to vector<4x16xf32>
    %c12_116 = arith.constant 12 : index
    %c0_117 = arith.constant 0 : index
    %99 = vector.load %arg14[%c12_116, %c0_117] : memref<16x16xf32, #tpu.memory_space<vmem>>, vector<4x16xf32>
    tpu.vector_store %arg14[%c12_116, %c0_117], %98 {strides = array<i32>} : memref<16x16xf32, #tpu.memory_space<vmem>>, vector<4x16xf32>,
    %c0_118 = arith.constant 0 : index
    %c0_119 = arith.constant 0 : index
    %100 = vector.load %arg13[%c0_118, %c0_119] : memref<16x8xf32, #tpu.memory_space<vmem>>, vector<16x8xf32>
    %c0_120 = arith.constant 0 : index
    %c0_121 = arith.constant 0 : index
    %101 = vector.load %arg14[%c0_120, %c0_121] : memref<16x16xf32, #tpu.memory_space<vmem>>, vector<16x16xf32>
    %c0_122 = arith.constant 0 : index
    %c0_123 = arith.constant 0 : index
    %102 = vector.load %arg6[%c0_122, %c0_123] : memref<8x32xf32, #tpu.memory_space<vmem>>, vector<8x32xf32>
    %cst_124 = arith.constant dense<0.000000e+00> : vector<16x32xf32>
    %103 = tpu.matmul %100, %102, %cst_124 {dimension_numbers = #tpu.dot_dimension_numbers<[1], [0], [0], [1], [0, 0, 1, 1], [], []>} : vector<16x8xf32>, vector<8x32xf32>, vector<16x32xf32> -> vector<16x32xf32>
    %c0_125 = arith.constant 0 : index
    %c0_126 = arith.constant 0 : index
    %104 = vector.load %arg7[%c0_125, %c0_126] : memref<1x32xf32, #tpu.memory_space<vmem>>, vector<1x32xf32>
    %105 = vector.broadcast %104 : vector<1x32xf32> to vector<16x32xf32>
    %106 = arith.addf %103, %105 : vector<16x32xf32>
    %c0_127 = arith.constant 0 : index
    %c0_128 = arith.constant 0 : index
    %107 = vector.load %arg8[%c0_127, %c0_128] : memref<16x32xf32, #tpu.memory_space<vmem>>, vector<16x32xf32>
    %cst_129 = arith.constant dense<0.000000e+00> : vector<16x32xf32>
    %108 = tpu.matmul %101, %107, %cst_129 {dimension_numbers = #tpu.dot_dimension_numbers<[1], [0], [0], [1], [0, 0, 1, 1], [], []>} : vector<16x16xf32>, vector<16x32xf32>, vector<16x32xf32> -> vector<16x32xf32>
    %c0_130 = arith.constant 0 : index
    %c0_131 = arith.constant 0 : index
    %109 = vector.load %arg9[%c0_130, %c0_131] : memref<1x32xf32, #tpu.memory_space<vmem>>, vector<1x32xf32>
    %110 = vector.broadcast %109 : vector<1x32xf32> to vector<16x32xf32>
    %111 = arith.addf %108, %110 : vector<16x32xf32>
    %112 = arith.addf %106, %111 : vector<16x32xf32>
    %cst_132 = arith.constant 0.000000e+00 : f32
    %113 = vector.broadcast %cst_132 : f32 to vector<16x32xf32>
    %114 = arith.maximumf %112, %113 : vector<16x32xf32>
    %c0_133 = arith.constant 0 : index
    %c0_134 = arith.constant 0 : index
    %c0_135 = arith.constant 0 : index
    %115 = vector.load %arg10[%c0_133, %c0_134, %c0_135] : memref<1x16x32xf32, #tpu.memory_space<vmem>>, vector<1x16x32xf32>
    %116 = vector.shape_cast %115 : vector<1x16x32xf32> to vector<16x32xf32>
    %117 = vector.shape_cast %114 : vector<16x32xf32> to vector<1x16x32xf32>
    tpu.vector_store %arg10[%c0_133, %c0_134, %c0_135], %117 {strides = array<i32>} : memref<1x16x32xf32, #tpu.memory_space<vmem>>, vector<1x16x32xf32>,
    return
  }
  func.func @transform_0(%arg0: i32) -> (i32, i32, i32) {
    %c0_i32 = arith.constant 0 : i32
    %c0_i32_0 = arith.constant 0 : i32
    %c0_i32_1 = arith.constant 0 : i32
    return %arg0, %c0_i32, %c0_i32_0 : i32, i32, i32
  }
  func.func @transform_1(%arg0: i32) -> (i32, i32) {
    %c0_i32 = arith.constant 0 : i32
    %c0_i32_0 = arith.constant 0 : i32
    %c0_i32_1 = arith.constant 0 : i32
    return %c0_i32, %c0_i32_0 : i32, i32
  }
  func.func @transform_2(%arg0: i32) -> (i32, i32) {
    %c0_i32 = arith.constant 0 : i32
    %c0_i32_0 = arith.constant 0 : i32
    %c0_i32_1 = arith.constant 0 : i32
    return %c0_i32, %c0_i32_0 : i32, i32
  }
  func.func @transform_3(%arg0: i32) -> (i32, i32, i32) {
    %c0_i32 = arith.constant 0 : i32
    %c0_i32_0 = arith.constant 0 : i32
    %c0_i32_1 = arith.constant 0 : i32
    %c0_i32_2 = arith.constant 0 : i32
    return %c0_i32, %c0_i32_0, %c0_i32_1 : i32, i32, i32
  }
  func.func @transform_4(%arg0: i32) -> (i32, i32) {
    %c0_i32 = arith.constant 0 : i32
    %c0_i32_0 = arith.constant 0 : i32
    %c0_i32_1 = arith.constant 0 : i32
    return %c0_i32, %c0_i32_0 : i32, i32
  }
  func.func @transform_5(%arg0: i32) -> (i32, i32) {
    %c0_i32 = arith.constant 0 : i32
    %c0_i32_0 = arith.constant 0 : i32
    %c0_i32_1 = arith.constant 0 : i32
    return %c0_i32, %c0_i32_0 : i32, i32
  }
  func.func @transform_6(%arg0: i32) -> (i32, i32) {
    %c0_i32 = arith.constant 0 : i32
    %c0_i32_0 = arith.constant 0 : i32
    %c0_i32_1 = arith.constant 0 : i32
    return %c0_i32, %c0_i32_0 : i32, i32
  }
  func.func @transform_7(%arg0: i32) -> (i32, i32) {
    %c0_i32 = arith.constant 0 : i32
    %c0_i32_0 = arith.constant 0 : i32
    %c0_i32_1 = arith.constant 0 : i32
    return %c0_i32, %c0_i32_0 : i32, i32
  }
  func.func @transform_8(%arg0: i32) -> (i32, i32) {
    %c0_i32 = arith.constant 0 : i32
    %c0_i32_0 = arith.constant 0 : i32
    %c0_i32_1 = arith.constant 0 : i32
    return %c0_i32, %c0_i32_0 : i32, i32
  }
  func.func @transform_9(%arg0: i32) -> (i32, i32, i32) {
    %c0_i32 = arith.constant 0 : i32
    %c0_i32_0 = arith.constant 0 : i32
    %c0_i32_1 = arith.constant 0 : i32
    return %arg0, %c0_i32, %c0_i32_0 : i32, i32, i32
  }
}

</mosaic_0001>

<bundles_post_ra>
// kernel: tpu_custom_call.1
= control target key start
LH: loop header
LB: loop body
LE: loop exit
PB: predicated region body
PF: predicated region fallthrough
CT: control target
= control target key end

     0   :  { %14 = vsyncpa [#allocation7], 0  ;;  %s3026_s0 = inlined_call_operand.vmem [shape: f32[2,64,16], index: 0, kind: input, shape index: {}]   ;;  %s3027_s1 = inlined_call_operand.vmem [shape: f32[16,8], index: 1, kind: input, shape index: {}]   ;;  %s3028_s2 = inlined_call_operand.vmem [shape: f32[1,8], index: 2, kind: input, shape index: {}]   ;;  %s3029_s3 = inlined_call_operand.vmem [shape: f32[9,8,8], index: 3, kind: input, shape index: {}]   ;;  %s3030_s4 = inlined_call_operand.vmem [shape: f32[1,8], index: 4, kind: input, shape index: {}]   ;;  %s3031_s5 = inlined_call_operand.vmem [shape: f32[8,32], index: 5, kind: input, shape index: {}]   ;;  %s3032_s6 = inlined_call_operand.vmem [shape: f32[1,32], index: 6, kind: input, shape index: {}]   ;;  %s3033_s7 = inlined_call_operand.vmem [shape: f32[16,32], index: 7, kind: input, shape index: {}]   ;;  %s3034_s8 = inlined_call_operand.vmem [shape: f32[1,32], index: 8, kind: input, shape index: {}]   ;;  %s3035_s9 = inlined_call_operand.hbm [shape: f32[2,16,32], index: 9, kind: output, shape index: {}]  }
   0x1   :  { %16 = vsyncpa [#allocation7 + $0x1], 0  ;;  %s2674_s30 = smov 0   ;;  %s2676_s10 = smov 0  }
   0x2   :  { %s2678_s11 = smov 0   ;;  %s2680_s12 = smov 0  }
   0x3 LB: > { %s2695_s13 = sadd.s32 4294967295, %s2618_s12   ;;  %s2151_s14 = sadd.s32 4294967294, %s2618_s12   ;;  %s2618_s12 = sphi %s2680_s12, %s3041_s12   ;;  %s2614_s11 = sphi %s2678_s11, %s3040_s11   ;;  %s2610_s10 = sphi %s2676_s10, %s3039_s10   ;;  %s2606_s30 = sphi %s2674_s30, %s3038_s30  }
   0x4   : > { %s2699_s15 = sadd.s32 1, %s2618_s12   ;;  %s223_s16 = sadd.s32 1, %s2614_s11 }
   0x5   : > { %s220_s17 = ssub.s32 %s2618_s12, %s2699_s15  ;;  %p233_p0 = scmp.ne.s32.totalorder %s2614_s11, %s2610_s10 }
   0x6   : > { %p221_p1 = scmp.eq.s32.totalorder %s220_s17, 0  ;;  %p234_p2 = scmp.eq.s32.totalorder %s2695_s13, 1 }
   0x7   : > { %p239_p3 = scmp.ne.s32.totalorder %s2610_s10, %s2606_s30  ;;  %p240_p4 = scmp.eq.s32.totalorder %s2151_s14, 1 }
   0x8   : > { %s2710_s18 = scalar_select %p221_p1, %s2614_s11, %s223_s16  }
   0x9   : > { %p2712_p5 = por %p234_p2, %p233_p0  ;;  %p2716_p6 = por %p240_p4, %p239_p3 }
   0xa   : > { %p2154_p7 = scmp.ge.s32.totalorder %s2618_s12, 1  ;;  %p290_p8 = scmp.lt.s32.totalorder %s2618_s12, 3 }
   0xc   : > { %p291_p9 = pnand %p2154_p7, %p290_p8 }
   0xd   : > { %p326_p10 = scmp.lt.s32.totalorder (!%p291_p9), %s2695_s13, 1  ;;  %s323_s23 = sand.u32 (!%p291_p9), 1, %s2610_s10  }
   0xe   : > { %294 = sbr.rel (%p291_p9) target bundleno = 742 (0x2e6), region = 56  ;;  %s2263_s14 = sshll.u32 (!%p291_p9), %s2695_s13, 8 }
   0xf   : > { %s2982_s22 = scalar_lea.hbm (!%p291_p9), %s3035_s9, %s2263_s14  ;;  %s2986_s24 = scalar_lea.sflag (!%p291_p9), [#allocation7], %s323_s23 }
  0x13   : > { %v340_v0 = vld [vmem:[%s3027_s1 + $0x8] sm:$0xff]  ;;  %v339_v1 = vld [vmem:[%s3027_s1] sm:$0xff]  ;;  %s327_s25 = scalar_select %p326_p10, %s2695_s13, 1  ;;  %vm348_vm0 = vcmask 130048   ;;  %vm486_vm1 = vcmask 64512   ;;  %vm488_vm2 = vcmask 58368  }
  0x14   : > { %2362 = vmatprep.subr.mxu0 %v340_v0  ;;  %vm493_vm3 = vcmask 57344   ;;  %v2620_v10 = vmov 0.0   ;;  %v2167_v11 = vld [vmem:[%s3029_s3 + $0x8] sm:$0xff]  ;;  %v2184_v12 = vld [vmem:[%s3029_s3 + $0x10] sm:$0xff]  ;;  %v531_v15 = vld [vmem:[%s3029_s3] sm:$0xff]  ;;  %vm1865_vm4 = vcmask 125952  }
  0x15   : > { %2363 = vmatpush3.msra.mxu0 %v340_v0  ;;  %s2262_s26 = sshll.u32 %s327_s25, 6  ;;  %487 = vst.msk [vmem:[#allocation2] sm:$0xff] %vm486_vm1, %v2620_v10  ;;  %491 = vst.msk [vmem:[#allocation2 + $0x90] sm:$0xff] %vm486_vm1, %v2620_v10  ;;  %2378 = vmatprep.subr.mxu1 %v2167_v11  ;;  %v2202_v16 = vld [vmem:[%s3029_s3 + $0x20] sm:$0xff]  ;;  %v2193_v41 = vld [vmem:[%s3029_s3 + $0x18] sm:$0xff]  ;;  %vm1862_vm5 = vcmask 60416  }
  0x16   : > { %2364 = vmatprep.subr.mxu0 %v339_v1  ;;  %s2733_s29 = scalar_lea.vmem %s3026_s0, %s2262_s26  ;;  %489 = vst.msk [vmem:[#allocation2 + $0x8] sm:$0x3] %vm488_vm2, %v2620_v10  ;;  %492 = vst.msk [vmem:[#allocation2 + $0x98] sm:$0x3] %vm488_vm2, %v2620_v10  ;;  %2379 = vmatpush3.msra.mxu1 %v2167_v11  ;;  %v2158_v17 = vld [vmem:[%s3028_s2] ss:$0 sm:$0xff] }
  0x17   : > { %2365 = vmatpush3.msra.mxu0 %v339_v1  ;;  %v331_v2 = vld [vmem:[%s2733_s29] sm:$0xff]  ;;  %v332_v3 = vld [vmem:[%s2733_s29 + $0x8] sm:$0xff]  ;;  %v333_v4 = vld [vmem:[%s2733_s29 + $0x10] sm:$0xff]  ;;  %495 = vst.msk [vmem:[#allocation2 + $0x10] sm:$0x1] %vm493_vm3, %v2620_v10  ;;  %2392 = vmatprep.subr.mxu1 %v531_v15  ;;  %s2155_s26 = sshll.u32 %s323_s23, 4 }
  0x18   : > { %2366 = vmatprep.mubr.msk.f32.mxu0 %vm348_vm0, %v331_v2  ;;  %v334_v5 = vld [vmem:[%s2733_s29 + $0x18] sm:$0xff]  ;;  %v335_v6 = vld [vmem:[%s2733_s29 + $0x20] sm:$0xff]  ;;  %v336_v7 = vld [vmem:[%s2733_s29 + $0x28] sm:$0xff]  ;;  %496 = vst.msk [vmem:[#allocation2 + $0x20] sm:$0x1] %vm493_vm3, %v2620_v10  ;;  %2406 = vmatprep.subr.mxu0 %v2184_v12  ;;  %s325_s16 = scalar_lea.vmem [#allocation6], %s2155_s26 }
  0x19   : > { %2367 = vmatmul.mubr.msk.f32.vlgmr.msra.gmra.mxu0 %vm348_vm0, %v332_v3  ;;  %v337_v8 = vld [vmem:[%s2733_s29 + $0x30] sm:$0xff]  ;;  %v338_v9 = vld [vmem:[%s2733_s29 + $0x38] sm:$0xff]  ;;  %497 = vst.msk [vmem:[#allocation2 + $0x30] sm:$0x1] %vm493_vm3, %v2620_v10  ;;  %498 = vst.msk [vmem:[#allocation2 + $0x40] sm:$0x1] %vm493_vm3, %v2620_v10 }
  0x1a   : > { %2369 = vmatprep.mubr.msk.f32.mxu0 %vm348_vm0, %v333_v4  ;;  %499 = vst.msk [vmem:[#allocation2 + $0x50] sm:$0x1] %vm493_vm3, %v2620_v10  ;;  %500 = vst.msk [vmem:[#allocation2 + $0x60] sm:$0x1] %vm493_vm3, %v2620_v10  ;;  %2407 = vmatpush3.msra.mxu0 %v2184_v12  ;;  %v2220_v49 = vld [vmem:[%s3029_s3 + $0x30] sm:$0xff]  ;;  %v2211_v60 = vld [vmem:[%s3029_s3 + $0x28] sm:$0xff] }
  0x1b   : > { %501 = vst.msk [vmem:[#allocation2 + $0x70] sm:$0x1] %vm493_vm3, %v2620_v10  ;;  %502 = vst.msk [vmem:[#allocation2 + $0x80] sm:$0x1] %vm493_vm3, %v2620_v10  ;;  %2434 = vmatprep.subr.mxu0 %v2202_v16  ;;  %v2238_v63 = vld [vmem:[%s3029_s3 + $0x40] sm:$0xff]  ;;  %s2089_s17 = sshll.u32 %s325_s16, 4  ;;  %s2984_s17 = int_to_ptr.vmem [resolvable:$true] %s2089_s17 }
  0x1c   : > { %505 = vst.msk [vmem:[#allocation2 + $0x19] sm:$0x1] %vm493_vm3, %v2620_v10  ;;  %506 = vst.msk [vmem:[#allocation2 + $0x29] sm:$0x1] %vm493_vm3, %v2620_v10  ;;  %vm2072_vm6 = vcmask 261120   ;;  %s2558_s13 = scalar_lea.vmem %s2984_s17, 256 }
  0x1d   : > { %2370 = vmatmul.mubr.msk.f32.gmra.mxu0 %vm348_vm0, %v334_v5  ;;  %507 = vst.msk [vmem:[#allocation2 + $0x39] sm:$0x1] %vm493_vm3, %v2620_v10  ;;  %508 = vst.msk [vmem:[#allocation2 + $0x49] sm:$0x1] %vm493_vm3, %v2620_v10  ;;  %v532_v13 = vld [vmem:[#allocation2 + $0x1] sm:$0xff]  ;;  %v2229_v5 = vld [vmem:[%s3029_s3 + $0x38] sm:$0xff]  ;;  %p2559_p11 = scmp.ne.s32.totalorder %s2984_s17, %s2558_s13 }
  0x1e   : > { %2372 = vmatprep.mubr.msk.f32.mxu0 %vm348_vm0, %v335_v6  ;;  %509 = vst.msk [vmem:[#allocation2 + $0x59] sm:$0x1] %vm493_vm3, %v2620_v10  ;;  %510 = vst.msk [vmem:[#allocation2 + $0x69] sm:$0x1] %vm493_vm3, %v2620_v10  ;;  %2380 = vmatprep.mubr.msk.f32.mxu1 %vm486_vm1, %v532_v13  ;;  %s2621_s25 = smov [#allocation6]  }
  0x1f   : > { %511 = vst.msk [vmem:[#allocation2 + $0x79] sm:$0x1] %vm493_vm3, %v2620_v10  ;;  %512 = vst.msk [vmem:[#allocation2 + $0x89] sm:$0x1] %vm493_vm3, %v2620_v10  ;;  %p2560_p12 = pnand %p2559_p11, %p2712_p5  ;;  %s2562_s26 = sshll.u32 %s2621_s25, 4  ;;  %s2563_s26 = int_to_ptr.vmem [resolvable:$false] %s2562_s26 }
  0x20   : > { %504 = vst.msk [vmem:[#allocation2 + $0x9] sm:$0x1] %vm493_vm3, %v2620_v10  ;;  %494 = vst.msk [vmem:[#allocation2] sm:$0x1] %vm493_vm3, %v2620_v10  ;;  %s2564_s27 = scalar_lea.vmem %s2563_s26, 512  ;;  %p2565_p0 = scmp.lt.s32.totalorder %s2984_s17, %s2563_s26 }
  0x21   : > { %2373 = vmatmul.mubr.msk.f32.gmra.mxu0 %vm348_vm0, %v336_v7  ;;  %513 = vst.msk [vmem:[#allocation2 + $0x99] sm:$0x1] %vm493_vm3, %v2620_v10  ;;  %503 = vst.msk [vmem:[#allocation2 + $0x90] sm:$0x1] %vm493_vm3, %v2620_v10  ;;  %v1543_v10 = vld [vmem:[#allocation2 + $0x91] sm:$0xff]  ;;  %p2561_p13 = pneg %p2560_p12  ;;  %p2566_p1 = scmp.lt.s32.totalorder %s2564_s27, %s2558_s13 }
  0x22   : > { %2375 = vmatprep.mubr.msk.f32.mxu0 %vm348_vm0, %v337_v8  ;;  %v1864_v11 = vld [vmem:[%s2733_s29] ss:$2 sm:$0xf]  ;;  %v2248_v12 = vld [vmem:[%s2733_s29 + $0x10] ss:$2 sm:$0xf] }
  0x23   : > { %1866 = vst.msk [vmem:[#allocation5] sm:$0xf] %vm1865_vm4, %v1864_v11  ;;  %v2249_v13 = vld [vmem:[%s2733_s29 + $0x20] ss:$2 sm:$0xf]  ;;  %p2567_p2 = por %p2566_p1, %p2565_p0 }
  0x24   : > { %1872 = vst.msk [vmem:[#allocation5 + $0x4] sm:$0xf] %vm1865_vm4, %v2248_v12  ;;  %1878 = vst.msk [vmem:[#allocation5 + $0x8] sm:$0xf] %vm1865_vm4, %v2249_v13 }
  0x25   : > { %2376 = vmatmul.mubr.msk.f32.gmra.mxu0 %vm348_vm0, %v338_v9  ;;  %p2568_p3 = pnand %p2567_p2, %p2561_p13 }
  0x27   : > { %v800_v14 = vld [vmem:[#allocation2 + $0x2] sm:$0xff] }
  0x28   : > { %2408 = vmatprep.mubr.msk.f32.mxu0 %vm486_vm1, %v800_v14  ;;  %v523_v56 = vld [vmem:[#allocation2] sm:$0xff]  ;;  %v1396_v7 = vld [vmem:[#allocation2 + $0x90] sm:$0xff] }
  0x29   : > { %v1690_v9 = vld [vmem:[#allocation2 + $0x92] sm:$0xff] }
  0x2a   : > { %v2250_v14 = vld [vmem:[%s2733_s29 + $0x30] ss:$2 sm:$0xf] }
  0x2b   : > { %1884 = vst.msk [vmem:[#allocation5 + $0xc] sm:$0xf] %vm1865_vm4, %v2250_v14 }
  0xd9   : > { %v2368_v18 = vpop.f32.mrf.mxu0 }
  0xda   : > { %v445_v19 = vadd.f32 %v2368_v18, %v2158_v17  ;;  %v1887_v18 = vld [vmem:[#allocation5] sm:$0xff] }
  0xdb   : > { %v439_v20 = vpop.f32.mrf.mxu0 }
  0xdc   : > { %v479_v21 = vmax.f32 %v445_v19, 0.0  ;;  %v440_v22 = vadd.f32 %v2158_v17, %v439_v20  ;;  %v1888_v19 = vld [vmem:[#allocation5 + $0x8] sm:$0xff] }
  0xdd   : > { %v2371_v23 = vpop.f32.mrf.mxu0 }
  0xde   : > { %516 = vst.msk [vmem:[#allocation2 + $0x21] sm:$0xff] %vm486_vm1, %v479_v21  ;;  %v478_v24 = vmax.f32 %v440_v22, 0.0  ;;  %v455_v25 = vadd.f32 %v2371_v23, %v2158_v17 }
  0xdf   : > { %v449_v26 = vpop.f32.mrf.mxu0 }
  0xe0   : > { %515 = vst.msk [vmem:[#allocation2 + $0x11] sm:$0xff] %vm486_vm1, %v478_v24  ;;  %v481_v27 = vmax.f32 %v455_v25, 0.0  ;;  %v450_v28 = vadd.f32 %v2158_v17, %v449_v26 }
  0xe1   : > { %v2374_v29 = vpop.f32.mrf.mxu0 }
  0xe2   : > { %518 = vst.msk [vmem:[#allocation2 + $0x41] sm:$0xff] %vm486_vm1, %v481_v27  ;;  %v480_v30 = vmax.f32 %v450_v28, 0.0  ;;  %v465_v31 = vadd.f32 %v2374_v29, %v2158_v17 }
  0xe3   : > { %v459_v32 = vpop.f32.mrf.mxu0 }
  0xe4   : > { %517 = vst.msk [vmem:[#allocation2 + $0x31] sm:$0xff] %vm486_vm1, %v480_v30  ;;  %v483_v33 = vmax.f32 %v465_v31, 0.0  ;;  %v460_v34 = vadd.f32 %v2158_v17, %v459_v32 }
  0xe5   : > { %v2377_v35 = vpop.f32.mrf.mxu0  ;;  %v2804_v44 = vld [vmem:[#allocation2 + $0x21] sm:$0xff] }
  0xe6   : > { %520 = vst.msk [vmem:[#allocation2 + $0x61] sm:$0xff] %vm486_vm1, %v483_v33  ;;  %v482_v36 = vmax.f32 %v460_v34, 0.0  ;;  %v475_v37 = vadd.f32 %v2377_v35, %v2158_v17  ;;  %v2808_v45 = vld [vmem:[#allocation2 + $0x22] sm:$0xff] }
  0xe7   : > { %v469_v38 = vpop.f32.mrf.mxu0  ;;  %v533_v39 = vld [vmem:[#allocation2 + $0x11] sm:$0xff]  ;;  %v525_v61 = vld [vmem:[#allocation2 + $0x20] sm:$0xff] }
  0xe8   : > { %v2795_v40 = vld [vmem:[#allocation2 + $0x12] sm:$0xff]  ;;  %519 = vst.msk [vmem:[#allocation2 + $0x51] sm:$0xff] %vm486_vm1, %v482_v36  ;;  %v485_v42 = vmax.f32 %v475_v37, 0.0  ;;  %v470_v43 = vadd.f32 %v2158_v17, %v469_v38  ;;  %2381 = vmatmul.mubr.msk.f32.vlgmr.msra.gmra.mxu1 %vm486_vm1, %v533_v39  ;;  %v1978_v17 = vld [vmem:[%s3033_s7] sm:$0xff] }
  0xe9   : > { %2409 = vmatmul.mubr.msk.f32.vlgmr.msra.gmra.mxu0 %vm486_vm1, %v2795_v40  ;;  %2393 = vmatpush3.msra.mxu1 %v531_v15  ;;  %v2825_v50 = vld [vmem:[#allocation2 + $0x41] sm:$0xff]  ;;  %v524_v59 = vld [vmem:[#allocation2 + $0x10] sm:$0xff] }
  0xea   : > { %2383 = vmatprep.mubr.msk.f32.mxu1 %vm486_vm1, %v2804_v44  ;;  %522 = vst.msk [vmem:[#allocation2 + $0x81] sm:$0xff] %vm486_vm1, %v485_v42  ;;  %v484_v46 = vmax.f32 %v470_v43, 0.0  ;;  %2411 = vmatprep.mubr.msk.f32.mxu0 %vm486_vm1, %v2808_v45  ;;  %v2827_v51 = vld [vmem:[#allocation2 + $0x42] sm:$0xff] }
  0xeb   : > { %2420 = vmatprep.subr.mxu1 %v2193_v41  ;;  %v2813_v47 = vld [vmem:[#allocation2 + $0x31] sm:$0xff]  ;;  %2435 = vmatpush3.msra.mxu0 %v2202_v16  ;;  %v527_v0 = vld [vmem:[#allocation2 + $0x40] sm:$0xff]  ;;  %v1979_v16 = vld [vmem:[%s3033_s7 + $0x8] sm:$0xff] }
  0xec   : > { %v2815_v48 = vld [vmem:[#allocation2 + $0x32] sm:$0xff]  ;;  %521 = vst.msk [vmem:[#allocation2 + $0x71] sm:$0xff] %vm486_vm1, %v484_v46  ;;  %2384 = vmatmul.mubr.msk.f32.gmra.mxu1 %vm486_vm1, %v2813_v47  ;;  %2462 = vmatprep.subr.mxu0 %v2220_v49  ;;  %v1889_v15 = vld [vmem:[%s3031_s5] sm:$0xff] }
  0xed   : > { %2412 = vmatmul.mubr.msk.f32.gmra.mxu0 %vm486_vm1, %v2815_v48  ;;  %2386 = vmatprep.mubr.msk.f32.mxu1 %vm486_vm1, %v2825_v50  ;;  %v2841_v54 = vld [vmem:[#allocation2 + $0x61] sm:$0xff]  ;;  %v526_v62 = vld [vmem:[#allocation2 + $0x30] sm:$0xff] }
  0xee   : > { %2414 = vmatprep.mubr.msk.f32.mxu0 %vm486_vm1, %v2827_v51  ;;  %v2843_v55 = vld [vmem:[#allocation2 + $0x62] sm:$0xff] }
  0xef   : > { %v2833_v52 = vld [vmem:[#allocation2 + $0x51] sm:$0xff]  ;;  %v529_v2 = vld [vmem:[#allocation2 + $0x60] sm:$0xff] }
  0xf0   : > { %v2835_v53 = vld [vmem:[#allocation2 + $0x52] sm:$0xff]  ;;  %2387 = vmatmul.mubr.msk.f32.gmra.mxu1 %vm486_vm1, %v2833_v52 }
  0xf1   : > { %2415 = vmatmul.mubr.msk.f32.gmra.mxu0 %vm486_vm1, %v2835_v53  ;;  %2389 = vmatprep.mubr.msk.f32.mxu1 %vm486_vm1, %v2841_v54  ;;  %v528_v1 = vld [vmem:[#allocation2 + $0x50] sm:$0xff]  ;;  %v1101_v4 = vld [vmem:[#allocation2 + $0x81] sm:$0xff] }
  0xf2   : > { %2417 = vmatprep.mubr.msk.f32.mxu0 %vm486_vm1, %v2843_v55  ;;  %v1395_v6 = vld [vmem:[#allocation2 + $0x80] sm:$0xff] }
  0xf3   : > { %v2849_v57 = vld [vmem:[#allocation2 + $0x71] sm:$0xff]  ;;  %v1689_v8 = vld [vmem:[#allocation2 + $0x82] sm:$0xff] }
  0xf4   : > { %v2851_v58 = vld [vmem:[#allocation2 + $0x72] sm:$0xff]  ;;  %2390 = vmatmul.mubr.msk.f32.gmra.mxu1 %vm486_vm1, %v2849_v57 }
  0xf5   : > { %2418 = vmatmul.mubr.msk.f32.gmra.mxu0 %vm486_vm1, %v2851_v58  ;;  %2394 = vmatprep.mubr.msk.f32.mxu1 %vm486_vm1, %v523_v56  ;;  %v530_v3 = vld [vmem:[#allocation2 + $0x70] sm:$0xff] }
  0xf6   : > { %2436 = vmatprep.mubr.msk.f32.mxu0 %vm486_vm1, %v533_v39 }
  0xf8   : > { %2395 = vmatmul.mubr.msk.f32.vlgmr.msra.gmra.mxu1 %vm486_vm1, %v524_v59 }
  0xf9   : > { %2437 = vmatmul.mubr.msk.f32.vlgmr.msra.gmra.mxu0 %vm486_vm1, %v2804_v44  ;;  %2421 = vmatpush3.msra.mxu1 %v2193_v41 }
  0xfa   : > { %2397 = vmatprep.mubr.msk.f32.mxu1 %vm486_vm1, %v525_v61  ;;  %2439 = vmatprep.mubr.msk.f32.mxu0 %vm486_vm1, %v2813_v47 }
  0xfb   : > { %2448 = vmatprep.subr.mxu1 %v2211_v60  ;;  %2463 = vmatpush3.msra.mxu0 %v2220_v49 }
  0xfc   : > { %2398 = vmatmul.mubr.msk.f32.gmra.mxu1 %vm486_vm1, %v526_v62  ;;  %2490 = vmatprep.subr.mxu0 %v2238_v63 }
  0xfd   : > { %2440 = vmatmul.mubr.msk.f32.gmra.mxu0 %vm486_vm1, %v2825_v50  ;;  %2400 = vmatprep.mubr.msk.f32.mxu1 %vm486_vm1, %v527_v0 }
  0xfe   : > { %2442 = vmatprep.mubr.msk.f32.mxu0 %vm486_vm1, %v2833_v52 }
 0x100   : > { %2401 = vmatmul.mubr.msk.f32.gmra.mxu1 %vm486_vm1, %v528_v1 }
 0x101   : > { %2443 = vmatmul.mubr.msk.f32.gmra.mxu0 %vm486_vm1, %v2841_v54  ;;  %2403 = vmatprep.mubr.msk.f32.mxu1 %vm486_vm1, %v529_v2 }
 0x102   : > { %2445 = vmatprep.mubr.msk.f32.mxu0 %vm486_vm1, %v2849_v57 }
 0x104   : > { %2404 = vmatmul.mubr.msk.f32.gmra.mxu1 %vm486_vm1, %v530_v3 }
 0x105   : > { %2446 = vmatmul.mubr.msk.f32.gmra.mxu0 %vm486_vm1, %v1101_v4  ;;  %2422 = vmatprep.mubr.msk.f32.mxu1 %vm486_vm1, %v524_v59 }
 0x106   : > { %2464 = vmatprep.mubr.msk.f32.mxu0 %vm486_vm1, %v525_v61 }
 0x108   : > { %2423 = vmatmul.mubr.msk.f32.vlgmr.msra.gmra.mxu1 %vm486_vm1, %v525_v61 }
 0x109   : > { %2465 = vmatmul.mubr.msk.f32.vlgmr.msra.gmra.mxu0 %vm486_vm1, %v526_v62  ;;  %2449 = vmatpush3.msra.mxu1 %v2211_v60 }
 0x10a   : > { %2425 = vmatprep.mubr.msk.f32.mxu1 %vm486_vm1, %v526_v62  ;;  %2467 = vmatprep.mubr.msk.f32.mxu0 %vm486_vm1, %v527_v0 }
 0x10b   : > { %2476 = vmatprep.subr.mxu1 %v2229_v5  ;;  %2491 = vmatpush3.msra.mxu0 %v2238_v63 }
 0x10c   : > { %2426 = vmatmul.mubr.msk.f32.gmra.mxu1 %vm486_vm1, %v527_v0  ;;  %2509 = vmatprep.subr.mxu0 %v1979_v16 }
 0x10d   : > { %2468 = vmatmul.mubr.msk.f32.gmra.mxu0 %vm486_vm1, %v528_v1  ;;  %2428 = vmatprep.mubr.msk.f32.mxu1 %vm486_vm1, %v528_v1 }
 0x10e   : > { %2470 = vmatprep.mubr.msk.f32.mxu0 %vm486_vm1, %v529_v2 }
 0x110   : > { %2429 = vmatmul.mubr.msk.f32.gmra.mxu1 %vm486_vm1, %v529_v2 }
 0x111   : > { %2471 = vmatmul.mubr.msk.f32.gmra.mxu0 %vm486_vm1, %v530_v3  ;;  %2431 = vmatprep.mubr.msk.f32.mxu1 %vm486_vm1, %v530_v3 }
 0x112   : > { %2473 = vmatprep.mubr.msk.f32.mxu0 %vm486_vm1, %v1395_v6 }
 0x114   : > { %2432 = vmatmul.mubr.msk.f32.gmra.mxu1 %vm486_vm1, %v1395_v6 }
 0x115   : > { %2474 = vmatmul.mubr.msk.f32.gmra.mxu0 %vm486_vm1, %v1396_v7  ;;  %2450 = vmatprep.mubr.msk.f32.mxu1 %vm486_vm1, %v2795_v40 }
 0x116   : > { %2492 = vmatprep.mubr.msk.f32.mxu0 %vm486_vm1, %v2808_v45 }
 0x118   : > { %2451 = vmatmul.mubr.msk.f32.vlgmr.msra.gmra.mxu1 %vm486_vm1, %v2808_v45 }
 0x119   : > { %2493 = vmatmul.mubr.msk.f32.vlgmr.msra.gmra.mxu0 %vm486_vm1, %v2815_v48  ;;  %2477 = vmatpush3.msra.mxu1 %v2229_v5 }
 0x11a   : > { %2453 = vmatprep.mubr.msk.f32.mxu1 %vm486_vm1, %v2815_v48  ;;  %2495 = vmatprep.mubr.msk.f32.mxu0 %vm486_vm1, %v2827_v51 }
 0x11b   : > { %2504 = vmatprep.subr.mxu1 %v1889_v15  ;;  %2510 = vmatpush3.msra.mxu0 %v1979_v16 }
 0x11c   : > { %2454 = vmatmul.mubr.msk.f32.gmra.mxu1 %vm486_vm1, %v2827_v51  ;;  %2511 = vmatprep.subr.mxu0 %v1978_v17 }
 0x11d   : > { %2496 = vmatmul.mubr.msk.f32.gmra.mxu0 %vm486_vm1, %v2835_v53  ;;  %2456 = vmatprep.mubr.msk.f32.mxu1 %vm486_vm1, %v2835_v53 }
 0x11e   : > { %2498 = vmatprep.mubr.msk.f32.mxu0 %vm486_vm1, %v2843_v55  ;;  %2512 = vmatpush3.msra.mxu0 %v1978_v17 }
 0x120   : > { %2457 = vmatmul.mubr.msk.f32.gmra.mxu1 %vm486_vm1, %v2843_v55 }
 0x121   : > { %2499 = vmatmul.mubr.msk.f32.gmra.mxu0 %vm486_vm1, %v2851_v58  ;;  %2459 = vmatprep.mubr.msk.f32.mxu1 %vm486_vm1, %v2851_v58 }
 0x122   : > { %2501 = vmatprep.mubr.msk.f32.mxu0 %vm486_vm1, %v1689_v8 }
 0x124   : > { %2460 = vmatmul.mubr.msk.f32.gmra.mxu1 %vm486_vm1, %v1689_v8 }
 0x125   : > { %2502 = vmatmul.mubr.msk.f32.gmra.mxu0 %vm486_vm1, %v1690_v9  ;;  %2478 = vmatprep.mubr.msk.f32.mxu1 %vm486_vm1, %v2804_v44 }
 0x126   : > { %2513 = vmatprep.mubr.msk.f32.mxu0 %vm348_vm0, %v1887_v18 }
 0x128   : > { %2479 = vmatmul.mubr.msk.f32.vlgmr.msra.gmra.mxu1 %vm486_vm1, %v2813_v47 }
 0x129   : > { %2481 = vmatprep.mubr.msk.f32.mxu1 %vm486_vm1, %v2825_v50  ;;  %2505 = vmatpush3.msra.mxu1 %v1889_v15 }
 0x12a   : > { %2514 = vmatmul.mubr.msk.f32.vlgmr.msra.gmra.mxu0 %vm348_vm0, %v1888_v19 }
 0x12c   : > { %2482 = vmatmul.mubr.msk.f32.gmra.mxu1 %vm486_vm1, %v2833_v52 }
 0x12d   : > { %2484 = vmatprep.mubr.msk.f32.mxu1 %vm486_vm1, %v2841_v54 }
 0x130   : > { %2485 = vmatmul.mubr.msk.f32.gmra.mxu1 %vm486_vm1, %v2849_v57 }
 0x131   : > { %2487 = vmatprep.mubr.msk.f32.mxu1 %vm486_vm1, %v1101_v4 }
 0x134   : > { %2488 = vmatmul.mubr.msk.f32.gmra.mxu1 %vm486_vm1, %v1543_v10 }
 0x1a8   : > { %v2382_v20 = vpop.f32.mrf.mxu1 }
 0x1a9   : > { %v2410_v21 = vpop.f32.mrf.mxu0 }
 0x1aa   : > { %v632_v22 = vpop.f32.mrf.mxu1 }
 0x1ab   : > { %v900_v23 = vpop.f32.mrf.mxu0 }
 0x1ac   : > { %v2385_v24 = vpop.f32.mrf.mxu1 }
 0x1ad   : > { %v2413_v25 = vpop.f32.mrf.mxu0 }
 0x1ae   : > { %v642_v26 = vpop.f32.mrf.mxu1 }
 0x1af   : > { %v910_v27 = vpop.f32.mrf.mxu0 }
 0x1b0   : > { %v2388_v28 = vpop.f32.mrf.mxu1 }
 0x1b1   : > { %v2416_v29 = vpop.f32.mrf.mxu0 }
 0x1b2   : > { %v652_v30 = vpop.f32.mrf.mxu1 }
 0x1b3   : > { %v920_v31 = vpop.f32.mrf.mxu0 }
 0x1b4   : > { %v2391_v32 = vpop.f32.mrf.mxu1 }
 0x1b5   : > { %v2419_v33 = vpop.f32.mrf.mxu0 }
 0x1b6   : > { %v662_v34 = vpop.f32.mrf.mxu1 }
 0x1b7   : > { %v930_v35 = vpop.f32.mrf.mxu0 }
 0x1b8   : > { %v2396_v36 = vpop.f32.mrf.mxu1 }
 0x1b9   : > { %v2438_v37 = vpop.f32.mrf.mxu0 }
 0x1ba   : > { %v761_v38 = vpop.f32.mrf.mxu1 }
 0x1bb   : > { %v1194_v39 = vpop.f32.mrf.mxu0  ;;  %v762_v4 = vadd.f32 %v761_v38, %v632_v22 }
 0x1bc   : > { %v2399_v40 = vpop.f32.mrf.mxu1 }
 0x1bd   : > { %v2441_v41 = vpop.f32.mrf.mxu0  ;;  %v939_v9 = vadd.f32 %v900_v23, %v762_v4 }
 0x1be   : > { %v771_v42 = vpop.f32.mrf.mxu1 }
 0x1bf   : > { %v1204_v43 = vpop.f32.mrf.mxu0  ;;  %v772_v8 = vadd.f32 %v771_v42, %v642_v26 }
 0x1c0   : > { %v2402_v44 = vpop.f32.mrf.mxu1 }
 0x1c1   : > { %v2444_v45 = vpop.f32.mrf.mxu0  ;;  %v941_v15 = vadd.f32 %v910_v27, %v772_v8  ;;  %v2247_v27 = vld [vmem:[%s3030_s4] ss:$0 sm:$0xff] }
 0x1c2   : > { %v781_v46 = vpop.f32.mrf.mxu1 }
 0x1c3   : > { %v1214_v47 = vpop.f32.mrf.mxu0  ;;  %v782_v13 = vadd.f32 %v781_v46, %v652_v30 }
 0x1c4   : > { %v2405_v48 = vpop.f32.mrf.mxu1 }
 0x1c5   : > { %v2447_v49 = vpop.f32.mrf.mxu0  ;;  %v943_v21 = vadd.f32 %v920_v31, %v782_v13  ;;  %v2251_v13 = vld [vmem:[%s3032_s6] ss:$0 sm:$0xff] }
 0x1c6   : > { %v791_v50 = vpop.f32.mrf.mxu1 }
 0x1c7   : > { %v1224_v51 = vpop.f32.mrf.mxu0  ;;  %v792_v20 = vadd.f32 %v791_v50, %v662_v34 }
 0x1c8   : > { %v2424_v52 = vpop.f32.mrf.mxu1 }
 0x1c9   : > { %v2466_v53 = vpop.f32.mrf.mxu0  ;;  %v945_v26 = vadd.f32 %v930_v35, %v792_v20 }
 0x1ca   : > { %v1047_v54 = vpop.f32.mrf.mxu1 }
 0x1cb   : > { %v1489_v55 = vpop.f32.mrf.mxu0  ;;  %v1086_v12 = vadd.f32 %v1047_v54, %v939_v9 }
 0x1cc   : > { %v2427_v56 = vpop.f32.mrf.mxu1 }
 0x1cd   : > { %v2469_v57 = vpop.f32.mrf.mxu0  ;;  %v1233_v19 = vadd.f32 %v1194_v39, %v1086_v12  ;;  %v2254_v12 = vld [vmem:[%s3034_s8] ss:$0 sm:$0xff] }
 0x1ce   : > { %v1057_v58 = vpop.f32.mrf.mxu1 }
 0x1cf   : > { %v1499_v59 = vpop.f32.mrf.mxu0  ;;  %v1088_v18 = vadd.f32 %v1057_v58, %v941_v15 }
 0x1d0   : > { %v2430_v60 = vpop.f32.mrf.mxu1 }
 0x1d1   : > { %v2472_v61 = vpop.f32.mrf.mxu0  ;;  %v1235_v32 = vadd.f32 %v1204_v43, %v1088_v18 }
 0x1d2   : > { %v1067_v62 = vpop.f32.mrf.mxu1 }
 0x1d3   : > { %v1509_v63 = vpop.f32.mrf.mxu0  ;;  %v1090_v22 = vadd.f32 %v1067_v62, %v943_v21 }
 0x1d4   : > { %v2433_v0 = vpop.f32.mrf.mxu1 }
 0x1d5   : > { %v2475_v1 = vpop.f32.mrf.mxu0  ;;  %v1237_v38 = vadd.f32 %v1214_v47, %v1090_v22 }
 0x1d6   : > { %v1077_v2 = vpop.f32.mrf.mxu1 }
 0x1d7   : > { %v1519_v5 = vpop.f32.mrf.mxu0  ;;  %v1092_v37 = vadd.f32 %v1077_v2, %v945_v26 }
 0x1d8   : > { %v2452_v3 = vpop.f32.mrf.mxu1 }
 0x1d9   : > { %v2494_v10 = vpop.f32.mrf.mxu0  ;;  %v1239_v45 = vadd.f32 %v1224_v51, %v1092_v37 }
 0x1da   : > { %v1341_v6 = vpop.f32.mrf.mxu1 }
 0x1db   : > { %v1783_v16 = vpop.f32.mrf.mxu0  ;;  %v1380_v25 = vadd.f32 %v1341_v6, %v1233_v19 }
 0x1dc   : > { %v2455_v7 = vpop.f32.mrf.mxu1 }
 0x1dd   : > { %v2497_v28 = vpop.f32.mrf.mxu0  ;;  %v1528_v36 = vadd.f32 %v1489_v55, %v1380_v25 }
 0x1de   : > { %v1351_v11 = vpop.f32.mrf.mxu1 }
 0x1df   : > { %v1382_v33 = vadd.f32 %v1351_v11, %v1235_v32  ;;  %v1793_v30 = vpop.f32.mrf.mxu0 }
 0x1e0   : > { %v2458_v14 = vpop.f32.mrf.mxu1 }
 0x1e1   : > { %v1530_v42 = vadd.f32 %v1499_v59, %v1382_v33  ;;  %v2500_v44 = vpop.f32.mrf.mxu0 }
 0x1e2   : > { %v1361_v17 = vpop.f32.mrf.mxu1 }
 0x1e3   : > { %v1384_v31 = vadd.f32 %v1361_v17, %v1237_v38  ;;  %v1803_v53 = vpop.f32.mrf.mxu0 }
 0x1e4   : > { %v2461_v24 = vpop.f32.mrf.mxu1 }
 0x1e5   : > { %v1532_v50 = vadd.f32 %v1509_v63, %v1384_v31  ;;  %v2503_v58 = vpop.f32.mrf.mxu0 }
 0x1e6   : > { %v1371_v29 = vpop.f32.mrf.mxu1 }
 0x1e7   : > { %v1386_v48 = vadd.f32 %v1371_v29, %v1239_v45  ;;  %v1813_v1 = vpop.f32.mrf.mxu0 }
 0x1e8   : > { %v2480_v23 = vpop.f32.mrf.mxu1 }
 0x1e9   : > { %v1534_v60 = vadd.f32 %v1519_v5, %v1386_v48 }
 0x1ea   : > { %v1636_v39 = vpop.f32.mrf.mxu1  ;;  %v2515_v11 = vpop.f32.mrf.mxu0 }
 0x1eb   : > { %v1675_v34 = vadd.f32 %v1636_v39, %v1528_v36  ;;  %v2065_v14 = vadd.f32 %v2515_v11, %v2254_v12 }
 0x1ec   : > { %v2483_v40 = vpop.f32.mrf.mxu1 }
 0x1ed   : > { %v1822_v41 = vadd.f32 %v1783_v16, %v1675_v34  ;;  %v2059_v16 = vpop.f32.mrf.mxu0 }
 0x1ee   : > { %v1646_v43 = vpop.f32.mrf.mxu1  ;;  %v2060_v20 = vadd.f32 %v2254_v12, %v2059_v16 }
 0x1ef   : > { %v1837_v35 = vadd.f32 %v2247_v27, %v1822_v41  ;;  %v1677_v46 = vadd.f32 %v1646_v43, %v1530_v42 }
 0x1f0   : > { %v2486_v49 = vpop.f32.mrf.mxu1 }
 0x1f1   : > { %v1845_v52 = vmax.f32 %v1837_v35, 0.0  ;;  %v1824_v47 = vadd.f32 %v1793_v30, %v1677_v46 }
 0x1f2   : > { %v1656_v54 = vpop.f32.mrf.mxu1 }
 0x1f3   : > { %1853 = vst.msk [vmem:[#allocation3] sm:$0xff] %vm486_vm1, %v1845_v52  ;;  %v1839_v55 = vadd.f32 %v2247_v27, %v1824_v47  ;;  %v1679_v56 = vadd.f32 %v1656_v54, %v1532_v50 }
 0x1f4   : > { %v2489_v57 = vpop.f32.mrf.mxu1 }
 0x1f5   : > { %v1847_v59 = vmax.f32 %v1839_v55, 0.0  ;;  %v1826_v61 = vadd.f32 %v1803_v53, %v1679_v56 }
 0x1f6   : > { %v1666_v51 = vpop.f32.mrf.mxu1 }
 0x1f7   : > { %1855 = vst.msk [vmem:[#allocation3 + $0x10] sm:$0xff] %vm486_vm1, %v1847_v59  ;;  %v1841_v62 = vadd.f32 %v2247_v27, %v1826_v61  ;;  %v1681_v0 = vadd.f32 %v1666_v51, %v1534_v60 }
 0x1f9   : > { %v1849_v63 = vmax.f32 %v1841_v62, 0.0  ;;  %v1828_v2 = vadd.f32 %v1813_v1, %v1681_v0 }
 0x1fa   : > { %v1861_v3 = vld [vmem:[#allocation3] ss:$2 sm:$0xf] }
 0x1fb   : > { %1857 = vst.msk [vmem:[#allocation3 + $0x20] sm:$0xff] %vm486_vm1, %v1849_v63  ;;  %v1843_v4 = vadd.f32 %v2247_v27, %v1828_v2 }
 0x1fc   : > { %1863 = vst.msk [vmem:[#allocation4] sm:$0xf] %vm1862_vm5, %v1861_v3 }
 0x1fd   : > { %v1851_v6 = vmax.f32 %v1843_v4, 0.0 }
 0x1fe   : > { %v1868_v7 = vld [vmem:[#allocation3 + $0x10] ss:$2 sm:$0xf] }
 0x1ff   : > { %1859 = vst.msk [vmem:[#allocation3 + $0x30] sm:$0xff] %vm486_vm1, %v1851_v6 }
 0x200   : > { %1869 = vst.msk [vmem:[#allocation4 + $0x4] sm:$0xf] %vm1862_vm5, %v1868_v7 }
 0x202   : > { %v1874_v5 = vld [vmem:[#allocation3 + $0x20] ss:$2 sm:$0xf] }
 0x203   : > { %1875 = vst.msk [vmem:[#allocation4 + $0x8] sm:$0xf] %vm1862_vm5, %v1874_v5 }
 0x206   : > { %v1880_v8 = vld [vmem:[#allocation3 + $0x30] ss:$2 sm:$0xf] }
 0x207   : > { %v1885_v9 = vld [vmem:[#allocation4] sm:$0xff]  ;;  %1881 = vst.msk [vmem:[#allocation4 + $0xc] sm:$0xf] %vm1862_vm5, %v1880_v8 }
 0x208   : > { %2506 = vmatprep.mubr.msk.f32.mxu1 %vm486_vm1, %v1885_v9 }
 0x20e   : > { %v1886_v10 = vld [vmem:[#allocation4 + $0x8] sm:$0xff] }
 0x20f   : > { %2507 = vmatmul.mubr.msk.f32.vlgmr.msra.gmra.mxu1 %vm486_vm1, %v1886_v10 }
 0x2cf   : > { %v2508_v15 = vpop.f32.mrf.mxu1 }
 0x2d0   : > { %v1975_v17 = vadd.f32 %v2508_v15, %v2251_v13 }
 0x2d1   : > { %v1969_v18 = vpop.f32.mrf.mxu1 }
 0x2d2   : > { %v2069_v19 = vadd.f32 %v2065_v14, %v1975_v17  ;;  %v1970_v21 = vadd.f32 %v2251_v13, %v1969_v18 }
 0x2d4   : > { %v2071_v24 = vmax.f32 %v2069_v19, 0.0  ;;  %v2068_v25 = vadd.f32 %v2060_v20, %v1970_v21 }
 0x2d6   : > { %2074 = vst.msk [vmem:[%s325_s16 + $0x8] sm:$0xff] %vm2072_vm6, %v2071_v24  ;;  %v2070_v22 = vmax.f32 %v2068_v25, 0.0 }
 0x2d8   : > { %2073 = vst.msk [vmem:[%s325_s16] sm:$0xff] %vm2072_vm6, %v2070_v22 }
 0x2d9   : > { %2571 = shalt.err (!%p2568_p3)
}
 0x2da   : > { %s2572_s23 = scalar_lea.hbm %s2982_s22, 256  ;;  %s2576_s16 = scalar_lea.hbm %s3035_s9, 512 }
 0x2db   : > { %p2573_p4 = scmp.ne.s32.totalorder %s2982_s22, %s2572_s23  ;;  %p2577_p9 = scmp.lt.s32.totalorder %s2982_s22, %s3035_s9 }
 0x2dc   : > { %p2578_p10 = scmp.lt.s32.totalorder %s2576_s16, %s2572_s23 }
 0x2dd   : > { %p2574_p7 = pnand %p2573_p4, %p2712_p5 }
 0x2de   : > { %p2579_p11 = por %p2578_p10, %p2577_p9 }
 0x2df   : > { %p2575_p8 = pneg %p2574_p7 }
 0x2e1   : > { %p2580_p12 = pnand %p2579_p11, %p2575_p8 }
 0x2e3   : > { %2583 = shalt.err (!%p2580_p12)
}
 0x2e4   : > { %s2622_s13 = smov 128   ;;  %s2623_s25 = smov 8  }
 0x2e5   : > { %2516 = dma.vmem_to_hbm [thread:$0]  (%p2712_p5), %s2984_s17, 256, %s2982_s22, %s2986_s24, %s2622_s13, %s2622_s13, %s2623_s25  }
 0x2e6 PF: > { %p2522_p13 = scmp.ge.s32.totalorder %s2618_s12, 2  ;;  %s2104_s26 = sand.u32 1, %s2606_s30  }
 0x2e7   : > { %s2105_s27 = scalar_lea.sflag [#allocation7], %s2104_s26 }
 0x2e8   : > { %p2519_p0 = pnand %p2522_p13, %p2716_p6 }
 0x2ea   : > { %p2520_p1 = pneg %p2519_p0 }
 0x2ec   : > { %2601 = dma.done.wait (%p2520_p1), %s2105_s27, 256  }
 0x2ed   : > { %2603 = vsyncadd (%p2520_p1), %s2105_s27, 4294967040  ;;  %p19_p2 = scmp.ge.s32.totalorder %s2699_s15, 4   ;;  %s3038_s30 = smov %s2610_s10 }
 0x2ee   : > { %s3039_s10 = smov %s2614_s11  ;;  %s3040_s11 = smov %s2710_s18 }
 0x2ef   : > { %s3041_s12 = smov %s2699_s15  ;;  %21 = sbr.rel (!%p19_p2) target bundleno = 3 (0x3), region = 108 }
 0x2f4   :  { %2110 = vsyncpa [#allocation7], 1 }
 0x2f5   :  { %2112 = vsyncpa [#allocation7 + $0x1], 1 }

</bundles_post_ra>
